<compile_context>
chip_gen: v7x
topology: tpu7x:2x2x1
jax: 0.10.0
libtpu: 0.0.40
codegen_flags: <defaults>
</compile_context>

<pallas_src>
import jax
import jax.numpy as jnp
from jax.experimental import pallas as pl
from jax.experimental.pallas import tpu as pltpu

# MaxIoUAssigner config (typical Faster-RCNN RCNN-stage defaults).
POS_IOU_THR = 0.5
NEG_IOU_THR = 0.5
MIN_POS_IOU = 0.5

# RandomSampler config.
SAMPLE_NUM = 64
POS_FRACTION = 0.25


def _assign_kernel(ng_ref, bb_ref, gt_ref, gl_ref, out_ref):
    """K images per grid step: IoU matrix [K, M, N] + max-IoU assignment."""
    bb = bb_ref[...]                       # [K, 4, N] f32 (proposals on lanes)
    gt = gt_ref[...]                       # [K, M, 4] f32 (gts on sublanes)
    gl = gl_ref[...]                       # [K, M, 1] i32
    ng = ng_ref[...]                       # [K, 1, 1] i32 (valid gts per image)

    K, _, N = bb.shape
    M = gt.shape[1]

    bx1 = bb[:, 0:1, :]                    # [K, 1, N]
    by1 = bb[:, 1:2, :]
    bx2 = bb[:, 2:3, :]
    by2 = bb[:, 3:4, :]
    gx1 = gt[:, :, 0:1]                    # [K, M, 1]
    gy1 = gt[:, :, 1:2]
    gx2 = gt[:, :, 2:3]
    gy2 = gt[:, :, 3:4]

    # Pairwise intersection / union -> IoU matrix [K, M, N].
    iw = jnp.maximum(jnp.minimum(bx2, gx2) - jnp.maximum(bx1, gx1), 0.0)
    ih = jnp.maximum(jnp.minimum(by2, gy2) - jnp.maximum(by1, gy1), 0.0)
    inter = iw * ih                                           # [K, M, N]

    area_b = (bx2 - bx1) * (by2 - by1)                        # [K, 1, N]
    area_g = (gx2 - gx1) * (gy2 - gy1)                        # [K, M, 1]
    union = area_b + area_g - inter
    # Divide via the (otherwise idle) EUP instead of an exact VPU divide.
    iou = inter * pl.reciprocal(jnp.maximum(union, 1e-6), approx=True)

    # Small [K, M, 1] validity mask; everything else broadcasts off it.
    gt_idx = jax.lax.broadcasted_iota(jnp.int32, (K, M, 1), 1)  # [K, M, 1]
    valid = gt_idx < ng                                          # [K, M, 1]
    iou_m = jnp.where(valid, iou, -1.0)                          # [K, M, N]

    # Per-proposal best gt (first gt wins ties, like torch.max).
    max_ovr = jnp.max(iou_m, axis=1, keepdims=True)                        # [K,1,N]
    is_max = (iou_m == max_ovr) & valid
    argmax = jnp.min(jnp.where(is_max, gt_idx, M), axis=1, keepdims=True)  # [K,1,N]

    # Per-gt best proposal ("rescue" step; gt_max_assign_all semantics,
    # later gt index wins on conflicts as in the mmdet loop).
    gt_max = jnp.max(iou_m, axis=2, keepdims=True)                         # [K,M,1]
    rescue = (iou_m == gt_max) & valid & (gt_max >= MIN_POS_IOU)
    rescue_assign = jnp.max(jnp.where(rescue, gt_idx + 1, 0),
                            axis=1, keepdims=True)                         # [K,1,N]

    assigned = jnp.full((K, 1, N), -1, dtype=jnp.int32)
    assigned = jnp.where((max_ovr >= 0.0) & (max_ovr < NEG_IOU_THR), 0, assigned)
    assigned = jnp.where(max_ovr >= POS_IOU_THR, argmax + 1, assigned)
    assigned = jnp.where(rescue_assign > 0, rescue_assign, assigned)
    # MaxIoUAllNegAssigner: if the image has no gt boxes, everything is negative.
    no_gt = ng == 0                                                        # [K,1,1]
    assigned = jnp.where(no_gt, 0, assigned)

    # Gather assigned gt labels via a one-hot sum over the (small) gt sublane axis.
    onehot = (gt_idx == (assigned - 1)) & (assigned > 0)
    lab = jnp.sum(jnp.where(onehot, gl, 0), axis=1, keepdims=True)
    lab = jnp.where(assigned > 0, lab, -1)

    ovr = jnp.where(no_gt, 0.0, max_ovr)

    # Single packed lane-dense output block [K, 3, N] (one output DMA per step).
    out_ref[:, 0:1, :] = assigned
    out_ref[:, 1:2, :] = pltpu.bitcast(ovr, jnp.int32)
    out_ref[:, 2:3, :] = lab


def max_iou_assign(bboxes, gt_bboxes_padded, gt_labels_padded, num_gts,
                   *, images_per_step=8):
    """bboxes [B,N,4] f32, gt_bboxes_padded [B,M,4] f32, gt_labels_padded [B,M] i32,
    num_gts [B] i32 -> (assigned_gt_inds [B,N] i32, max_overlaps [B,N] f32,
    assigned_labels [B,N] i32)."""
    B, N, _ = bboxes.shape
    M = gt_bboxes_padded.shape[1]
    assert N % 128 == 0, "proposal count must be a multiple of 128 (lane axis)"

    # gt slots only need a multiple of 8 (they live on the sublane axis).
    M_pad = ((M + 7) // 8) * 8
    if M_pad != M:
        gt_bboxes_padded = jnp.pad(gt_bboxes_padded,
                                   ((0, 0), (0, M_pad - M), (0, 0)))
        gt_labels_padded = jnp.pad(gt_labels_padded, ((0, 0), (0, M_pad - M)))
        M = M_pad

    # Batch several images per grid step to amortise per-step overhead.
    K = min(images_per_step, B)
    Bp = ((B + K - 1) // K) * K

    bboxes_t = jnp.transpose(bboxes.astype(jnp.float32), (0, 2, 1))   # [B,4,N]
    gt = gt_bboxes_padded.astype(jnp.float32)                         # [B,M,4]
    labels = gt_labels_padded.astype(jnp.int32).reshape(B, M, 1)      # [B,M,1]
    ng = num_gts.astype(jnp.int32).reshape(B, 1, 1)                   # [B,1,1]

    if Bp != B:
        pad = Bp - B
        bboxes_t = jnp.pad(bboxes_t, ((0, pad), (0, 0), (0, 0)))
        gt = jnp.pad(gt, ((0, pad), (0, 0), (0, 0)))
        labels = jnp.pad(labels, ((0, pad), (0, 0), (0, 0)))
        ng = jnp.pad(ng, ((0, pad), (0, 0), (0, 0)))  # padded images: 0 gts

    packed = pl.pallas_call(
        _assign_kernel,
        out_shape=jax.ShapeDtypeStruct((Bp, 3, N), jnp.int32),
        grid=(Bp // K,),
        in_specs=[
            pl.BlockSpec((K, 1, 1), lambda b: (b, 0, 0)),
            pl.BlockSpec((K, 4, N), lambda b: (b, 0, 0)),
            pl.BlockSpec((K, M, 4), lambda b: (b, 0, 0)),
            pl.BlockSpec((K, M, 1), lambda b: (b, 0, 0)),
        ],
        out_specs=pl.BlockSpec((K, 3, N), lambda b: (b, 0, 0)),
        compiler_params=pltpu.CompilerParams(
            dimension_semantics=("parallel",)),   # v7x: split batch over both TCs
    )(ng, bboxes_t, gt, labels)

    assigned = packed[:B, 0, :]
    max_ovr = jax.lax.bitcast_convert_type(packed[:B, 1, :], jnp.float32)
    lab = packed[:B, 2, :]
    return assigned, max_ovr, lab


def random_sample(key, assigned_gt_inds, num=SAMPLE_NUM, pos_fraction=POS_FRACTION):
    """RandomSampler (static shapes + validity masks); vmap-able over the batch.

    Matches mmdet semantics: up to int(num*pos_fraction) positives are drawn at
    random; negatives fill the remaining quota (num - sampled_pos)."""
    # TODO(synk): add_gt_as_proposals (prepending gt boxes to the proposal list)
    # is not reproduced; sampling is done over the proposal set only.
    num_pos_exp = int(num * pos_fraction)
    k1, k2 = jax.random.split(key)

    pos_mask = assigned_gt_inds > 0
    pos_scores = jnp.where(pos_mask, jax.random.uniform(k1, pos_mask.shape), -1.0)
    pos_top, pos_inds = jax.lax.top_k(pos_scores, num_pos_exp)
    pos_valid = pos_top >= 0.0
    num_pos_actual = jnp.sum(pos_valid.astype(jnp.int32))

    num_neg_exp = num - num_pos_actual           # dynamic quota, static buffer
    neg_mask = assigned_gt_inds == 0
    neg_scores = jnp.where(neg_mask, jax.random.uniform(k2, neg_mask.shape), -1.0)
    neg_top, neg_inds = jax.lax.top_k(neg_scores, num)
    neg_valid = (neg_top >= 0.0) & (jnp.arange(num) < num_neg_exp)

    return dict(pos_inds=pos_inds, pos_valid=pos_valid,
                neg_inds=neg_inds, neg_valid=neg_valid)


@jax.jit
def _assigner_batched(bboxes, gt_bboxes, gt_labels, num_gts, keys):
    assigned, max_ovr, lab = max_iou_assign(bboxes, gt_bboxes, gt_labels, num_gts)
    sampled = jax.vmap(random_sample)(keys, assigned)
    return assigned, max_ovr, lab, sampled


def assigner_forward(bboxes, gt_bboxes, gt_labels, num_gts, key):
    """Mirror of Assigner.forward: per-image assign + sample (single dispatch)."""
    # TODO(synk): gt_bboxes_ignore / ignore_iof_thr path is not reproduced
    # (typical configs use ignore_iof_thr=-1, i.e. disabled).
    B = bboxes.shape[0]
    keys = jax.random.split(key, B)
    assigned, max_ovr, lab, sampled = _assigner_batched(
        bboxes, gt_bboxes, gt_labels, num_gts, keys)
    results = []
    for i in range(B):
        results.append(dict(
            assigned_gt_inds=assigned[i],
            max_overlaps=max_ovr[i],
            assigned_labels=lab[i],
            pos_inds=sampled["pos_inds"][i],
            pos_valid=sampled["pos_valid"][i],
            neg_inds=sampled["neg_inds"][i],
            neg_valid=sampled["neg_valid"][i]))
    return results


def _reference_max_overlaps(bboxes, gt_bboxes, num_gts):
    """Pure-JAX IoU max (exact divide) for a sanity check."""
    M = gt_bboxes.shape[1]
    bx1, by1, bx2, by2 = [bboxes[..., i:i + 1] for i in range(4)]          # [B,N,1]
    gx1, gy1, gx2, gy2 = [gt_bboxes[..., i][:, None, :] for i in range(4)]  # [B,1,M]
    iw = jnp.maximum(jnp.minimum(bx2, gx2) - jnp.maximum(bx1, gx1), 0.0)
    ih = jnp.maximum(jnp.minimum(by2, gy2) - jnp.maximum(by1, gy1), 0.0)
    inter = iw * ih
    area_b = (bx2 - bx1) * (by2 - by1)
    area_g = (gx2 - gx1) * (gy2 - gy1)
    iou = inter / jnp.maximum(area_b + area_g - inter, 1e-6)               # [B,N,M]
    valid = jnp.arange(M)[None, None, :] < num_gts[:, None, None]
    iou = jnp.where(valid, iou, -1.0)
    ovr = jnp.max(iou, axis=-1)
    return jnp.where(num_gts[:, None] == 0, 0.0, ovr)


if __name__ == "__main__":
    B, N = 2, 256        # images, proposals per image
    M_PAD = 16           # padded gt slots (multiple of 8 -> sublane axis)
    num_gts = jnp.array([8, 5], dtype=jnp.int32)

    key = jax.random.PRNGKey(0)
    kb, kg, kl, ks = jax.random.split(key, 4)

    # Proposals: x1y1 in [0,48), w/h in [4,20) -> (x1,y1,x2,y2) in a 64x64 image.
    xy = jax.random.uniform(kb, (B, N, 2), minval=0.0, maxval=48.0)
    wh = jax.random.uniform(jax.random.fold_in(kb, 1), (B, N, 2),
                            minval=4.0, maxval=20.0)
    bboxes = jnp.concatenate([xy, xy + wh], axis=-1).astype(jnp.float32)

    # GT boxes (padded to M_PAD with zeros; only the first num_gts[b] are valid).
    gxy = jax.random.uniform(kg, (B, M_PAD, 2), minval=0.0, maxval=48.0)
    gwh = jax.random.uniform(jax.random.fold_in(kg, 1), (B, M_PAD, 2),
                             minval=8.0, maxval=24.0)
    gt_bboxes = jnp.concatenate([gxy, gxy + gwh], axis=-1).astype(jnp.float32)
    slot = jnp.arange(M_PAD)[None, :]
    gt_mask = slot < num_gts[:, None]
    gt_bboxes = jnp.where(gt_mask[..., None], gt_bboxes, 0.0)

    gt_labels = jax.random.randint(kl, (B, M_PAD), 1, 4).astype(jnp.int32)
    gt_labels = jnp.where(gt_mask, gt_labels, 0)

    results = assigner_forward(bboxes, gt_bboxes, gt_labels, num_gts, ks)
    for r in results:
        jax.block_until_ready(r["assigned_gt_inds"])
        jax.block_until_ready(r["pos_inds"])

    # Light sanity checks.
    ref_ovr = _reference_max_overlaps(bboxes, gt_bboxes, num_gts)
    for i in range(B):
        inds = results[i]["assigned_gt_inds"]
        labs = results[i]["assigned_labels"]
        ovrs = results[i]["max_overlaps"]
        assert inds.shape == (N,)
        assert int(jnp.max(inds)) <= int(num_gts[i])
        assert int(jnp.min(inds)) >= -1
        assert bool(jnp.all((inds > 0) == (labs > 0)))
        assert bool(jnp.allclose(ovrs, ref_ovr[i], atol=1e-2, rtol=1e-2))
        # Sampler invariants: valid pos indices point at positives, valid negs at negatives.
        pos_ok = jnp.where(results[i]["pos_valid"], inds[results[i]["pos_inds"]] > 0, True)
        neg_ok = jnp.where(results[i]["neg_valid"], inds[results[i]["neg_inds"]] == 0, True)
        assert bool(jnp.all(pos_ok)) and bool(jnp.all(neg_ok))
        assert int(jnp.sum(results[i]["pos_valid"]) + jnp.sum(results[i]["neg_valid"])) <= SAMPLE_NUM
    print("KERNEL_OK")
</pallas_src>

<mosaic_0001>
module attributes {stable_mosaic.version = 11 : i64} {
  func.func @_assign_kernel(%arg0: i32, %arg1: memref<2x1x1xi32, #tpu.memory_space<vmem>>, %arg2: memref<2x4x256xf32, #tpu.memory_space<vmem>>, %arg3: memref<2x16x4xf32, #tpu.memory_space<vmem>>, %arg4: memref<2x16x1xi32, #tpu.memory_space<vmem>>, %arg5: memref<2x3x256xi32, #tpu.memory_space<vmem>>) attributes {dimension_semantics = [#tpu.dimension_semantics<parallel>], iteration_bounds = array<i64: 1>, scalar_prefetch = 0 : i64, scratch_operands = 0 : i64, tpu.core_type = #tpu.core_type<tc>, window_params = [{transform_indices = @transform_0, window_bounds = array<i64: 2, 1, 1>}, {transform_indices = @transform_1, window_bounds = array<i64: 2, 4, 256>}, {transform_indices = @transform_2, window_bounds = array<i64: 2, 16, 4>}, {transform_indices = @transform_3, window_bounds = array<i64: 2, 16, 1>}, {transform_indices = @transform_4, window_bounds = array<i64: 2, 3, 256>}]} {
    %c0 = arith.constant 0 : index
    %c0_0 = arith.constant 0 : index
    %c0_1 = arith.constant 0 : index
    %0 = vector.load %arg2[%c0, %c0_0, %c0_1] : memref<2x4x256xf32, #tpu.memory_space<vmem>>, vector<2x4x256xf32>
    %c0_2 = arith.constant 0 : index
    %c0_3 = arith.constant 0 : index
    %c0_4 = arith.constant 0 : index
    %1 = vector.load %arg3[%c0_2, %c0_3, %c0_4] : memref<2x16x4xf32, #tpu.memory_space<vmem>>, vector<2x16x4xf32>
    %c0_5 = arith.constant 0 : index
    %c0_6 = arith.constant 0 : index
    %c0_7 = arith.constant 0 : index
    %2 = vector.load %arg4[%c0_5, %c0_6, %c0_7] : memref<2x16x1xi32, #tpu.memory_space<vmem>>, vector<2x16x1xi32>
    %c0_8 = arith.constant 0 : index
    %c0_9 = arith.constant 0 : index
    %c0_10 = arith.constant 0 : index
    %3 = vector.load %arg1[%c0_8, %c0_9, %c0_10] : memref<2x1x1xi32, #tpu.memory_space<vmem>>, vector<2x1x1xi32>
    %4 = vector.extract_strided_slice %0 {offsets = [0, 0, 0], sizes = [2, 1, 256], strides = [1, 1, 1]} : vector<2x4x256xf32> to vector<2x1x256xf32>
    %5 = vector.extract_strided_slice %0 {offsets = [0, 1, 0], sizes = [2, 1, 256], strides = [1, 1, 1]} : vector<2x4x256xf32> to vector<2x1x256xf32>
    %6 = vector.extract_strided_slice %0 {offsets = [0, 2, 0], sizes = [2, 1, 256], strides = [1, 1, 1]} : vector<2x4x256xf32> to vector<2x1x256xf32>
    %7 = vector.extract_strided_slice %0 {offsets = [0, 3, 0], sizes = [2, 1, 256], strides = [1, 1, 1]} : vector<2x4x256xf32> to vector<2x1x256xf32>
    %8 = vector.extract_strided_slice %1 {offsets = [0, 0, 0], sizes = [2, 16, 1], strides = [1, 1, 1]} : vector<2x16x4xf32> to vector<2x16x1xf32>
    %9 = vector.extract_strided_slice %1 {offsets = [0, 0, 1], sizes = [2, 16, 1], strides = [1, 1, 1]} : vector<2x16x4xf32> to vector<2x16x1xf32>
    %10 = vector.extract_strided_slice %1 {offsets = [0, 0, 2], sizes = [2, 16, 1], strides = [1, 1, 1]} : vector<2x16x4xf32> to vector<2x16x1xf32>
    %11 = vector.extract_strided_slice %1 {offsets = [0, 0, 3], sizes = [2, 16, 1], strides = [1, 1, 1]} : vector<2x16x4xf32> to vector<2x16x1xf32>
    %12 = vector.broadcast %6 : vector<2x1x256xf32> to vector<2x16x256xf32>
    %13 = vector.broadcast %10 : vector<2x16x1xf32> to vector<2x16x256xf32>
    %14 = arith.minimumf %12, %13 : vector<2x16x256xf32>
    %15 = vector.broadcast %4 : vector<2x1x256xf32> to vector<2x16x256xf32>
    %16 = vector.broadcast %8 : vector<2x16x1xf32> to vector<2x16x256xf32>
    %17 = arith.maximumf %15, %16 : vector<2x16x256xf32>
    %18 = arith.subf %14, %17 : vector<2x16x256xf32>
    %cst = arith.constant 0.000000e+00 : f32
    %19 = vector.broadcast %cst : f32 to vector<2x16x256xf32>
    %20 = arith.maximumf %18, %19 : vector<2x16x256xf32>
    %21 = vector.broadcast %7 : vector<2x1x256xf32> to vector<2x16x256xf32>
    %22 = vector.broadcast %11 : vector<2x16x1xf32> to vector<2x16x256xf32>
    %23 = arith.minimumf %21, %22 : vector<2x16x256xf32>
    %24 = vector.broadcast %5 : vector<2x1x256xf32> to vector<2x16x256xf32>
    %25 = vector.broadcast %9 : vector<2x16x1xf32> to vector<2x16x256xf32>
    %26 = arith.maximumf %24, %25 : vector<2x16x256xf32>
    %27 = arith.subf %23, %26 : vector<2x16x256xf32>
    %cst_11 = arith.constant 0.000000e+00 : f32
    %28 = vector.broadcast %cst_11 : f32 to vector<2x16x256xf32>
    %29 = arith.maximumf %27, %28 : vector<2x16x256xf32>
    %30 = arith.mulf %20, %29 : vector<2x16x256xf32>
    %31 = arith.subf %6, %4 : vector<2x1x256xf32>
    %32 = arith.subf %7, %5 : vector<2x1x256xf32>
    %33 = arith.mulf %31, %32 : vector<2x1x256xf32>
    %34 = arith.subf %10, %8 : vector<2x16x1xf32>
    %35 = arith.subf %11, %9 : vector<2x16x1xf32>
    %36 = arith.mulf %34, %35 : vector<2x16x1xf32>
    %37 = vector.broadcast %33 : vector<2x1x256xf32> to vector<2x16x256xf32>
    %38 = vector.broadcast %36 : vector<2x16x1xf32> to vector<2x16x256xf32>
    %39 = arith.addf %37, %38 : vector<2x16x256xf32>
    %40 = arith.subf %39, %30 : vector<2x16x256xf32>
    %cst_12 = arith.constant 9.99999997E-7 : f32
    %41 = vector.broadcast %cst_12 : f32 to vector<2x16x256xf32>
    %42 = arith.maximumf %40, %41 : vector<2x16x256xf32>
    %43 = tpu.reciprocal %42 {approx = true} : vector<2x16x256xf32> -> vector<2x16x256xf32>
    %44 = arith.mulf %30, %43 : vector<2x16x256xf32>
    %45 = tpu.iota {dimensions = array<i32: 1>} : vector<2x16x1xi32>
    %46 = vector.broadcast %3 : vector<2x1x1xi32> to vector<2x16x1xi32>
    %47 = arith.cmpi slt, %45, %46 : vector<2x16x1xi32>
    %cst_13 = arith.constant -1.000000e+00 : f32
    %48 = vector.shape_cast %47 : vector<2x16x1xi1> to vector<2x16x1xi1>
    %49 = vector.broadcast %48 : vector<2x16x1xi1> to vector<2x16x256xi1>
    %50 = vector.broadcast %cst_13 : f32 to vector<2x16x256xf32>
    %51 = arith.select %49, %44, %50 : vector<2x16x256xi1>, vector<2x16x256xf32>
    %cst_14 = arith.constant dense<0xFF800000> : vector<2x256xf32>
    %52 = vector.multi_reduction <maximumf>, %51, %cst_14 [1] : vector<2x16x256xf32> to vector<2x256xf32>
    %53 = vector.shape_cast %52 : vector<2x256xf32> to vector<2x1x256xf32>
    %54 = vector.broadcast %53 : vector<2x1x256xf32> to vector<2x16x256xf32>
    %55 = arith.cmpf oeq, %51, %54 : vector<2x16x256xf32>
    %56 = vector.broadcast %47 : vector<2x16x1xi1> to vector<2x16x256xi1>
    %57 = arith.andi %55, %56 : vector<2x16x256xi1>
    %c16_i32 = arith.constant 16 : i32
    %58 = vector.shape_cast %45 : vector<2x16x1xi32> to vector<2x16x1xi32>
    %59 = vector.broadcast %58 : vector<2x16x1xi32> to vector<2x16x256xi32>
    %60 = vector.broadcast %c16_i32 : i32 to vector<2x16x256xi32>
    %61 = arith.select %57, %59, %60 : vector<2x16x256xi1>, vector<2x16x256xi32>
    %cst_15 = arith.constant dense<2147483647> : vector<2x256xi32>
    %62 = vector.multi_reduction <minsi>, %61, %cst_15 [1] : vector<2x16x256xi32> to vector<2x256xi32>
    %63 = vector.shape_cast %62 : vector<2x256xi32> to vector<2x1x256xi32>
    %cst_16 = arith.constant dense<0xFF800000> : vector<2x16xf32>
    %64 = vector.multi_reduction <maximumf>, %51, %cst_16 [2] : vector<2x16x256xf32> to vector<2x16xf32>
    %65 = vector.shape_cast %64 : vector<2x16xf32> to vector<2x16x1xf32>
    %66 = vector.broadcast %65 : vector<2x16x1xf32> to vector<2x16x256xf32>
    %67 = arith.cmpf oeq, %51, %66 : vector<2x16x256xf32>
    %68 = vector.broadcast %47 : vector<2x16x1xi1> to vector<2x16x256xi1>
    %69 = arith.andi %67, %68 : vector<2x16x256xi1>
    %cst_17 = arith.constant 5.000000e-01 : f32
    %70 = vector.broadcast %cst_17 : f32 to vector<2x16x1xf32>
    %71 = arith.cmpf oge, %65, %70 : vector<2x16x1xf32>
    %72 = vector.broadcast %71 : vector<2x16x1xi1> to vector<2x16x256xi1>
    %73 = arith.andi %69, %72 : vector<2x16x256xi1>
    %c1_i32 = arith.constant 1 : i32
    %74 = vector.broadcast %c1_i32 : i32 to vector<2x16x1xi32>
    %75 = arith.addi %45, %74 : vector<2x16x1xi32>
    %c0_i32 = arith.constant 0 : i32
    %76 = vector.shape_cast %75 : vector<2x16x1xi32> to vector<2x16x1xi32>
    %77 = vector.broadcast %76 : vector<2x16x1xi32> to vector<2x16x256xi32>
    %78 = vector.broadcast %c0_i32 : i32 to vector<2x16x256xi32>
    %79 = arith.select %73, %77, %78 : vector<2x16x256xi1>, vector<2x16x256xi32>
    %cst_18 = arith.constant dense<-2147483648> : vector<2x256xi32>
    %80 = vector.multi_reduction <maxsi>, %79, %cst_18 [1] : vector<2x16x256xi32> to vector<2x256xi32>
    %81 = vector.shape_cast %80 : vector<2x256xi32> to vector<2x1x256xi32>
    %c-1_i32 = arith.constant -1 : i32
    %82 = vector.broadcast %c-1_i32 : i32 to vector<2x1x256xi32>
    %cst_19 = arith.constant 0.000000e+00 : f32
    %83 = vector.broadcast %cst_19 : f32 to vector<2x1x256xf32>
    %84 = arith.cmpf oge, %53, %83 : vector<2x1x256xf32>
    %cst_20 = arith.constant 5.000000e-01 : f32
    %85 = vector.broadcast %cst_20 : f32 to vector<2x1x256xf32>
    %86 = arith.cmpf olt, %53, %85 : vector<2x1x256xf32>
    %87 = arith.andi %84, %86 : vector<2x1x256xi1>
    %c0_i32_21 = arith.constant 0 : i32
    %88 = vector.broadcast %c0_i32_21 : i32 to vector<2x1x256xi32>
    %89 = arith.select %87, %88, %82 : vector<2x1x256xi1>, vector<2x1x256xi32>
    %cst_22 = arith.constant 5.000000e-01 : f32
    %90 = vector.broadcast %cst_22 : f32 to vector<2x1x256xf32>
    %91 = arith.cmpf oge, %53, %90 : vector<2x1x256xf32>
    %c1_i32_23 = arith.constant 1 : i32
    %92 = vector.broadcast %c1_i32_23 : i32 to vector<2x1x256xi32>
    %93 = arith.addi %63, %92 : vector<2x1x256xi32>
    %94 = arith.select %91, %93, %89 : vector<2x1x256xi1>, vector<2x1x256xi32>
    %c0_i32_24 = arith.constant 0 : i32
    %95 = vector.broadcast %c0_i32_24 : i32 to vector<2x1x256xi32>
    %96 = arith.cmpi sgt, %81, %95 : vector<2x1x256xi32>
    %97 = arith.select %96, %81, %94 : vector<2x1x256xi1>, vector<2x1x256xi32>
    %c0_i32_25 = arith.constant 0 : i32
    %98 = vector.broadcast %c0_i32_25 : i32 to vector<2x1x1xi32>
    %99 = arith.cmpi eq, %3, %98 : vector<2x1x1xi32>
    %c0_i32_26 = arith.constant 0 : i32
    %100 = vector.shape_cast %99 : vector<2x1x1xi1> to vector<2x1x1xi1>
    %101 = vector.broadcast %100 : vector<2x1x1xi1> to vector<2x1x256xi1>
    %102 = vector.broadcast %c0_i32_26 : i32 to vector<2x1x256xi32>
    %103 = arith.select %101, %102, %97 : vector<2x1x256xi1>, vector<2x1x256xi32>
    %c1_i32_27 = arith.constant 1 : i32
    %104 = vector.broadcast %c1_i32_27 : i32 to vector<2x1x256xi32>
    %105 = arith.subi %103, %104 : vector<2x1x256xi32>
    %106 = vector.broadcast %45 : vector<2x16x1xi32> to vector<2x16x256xi32>
    %107 = vector.broadcast %105 : vector<2x1x256xi32> to vector<2x16x256xi32>
    %108 = arith.cmpi eq, %106, %107 : vector<2x16x256xi32>
    %c0_i32_28 = arith.constant 0 : i32
    %109 = vector.broadcast %c0_i32_28 : i32 to vector<2x1x256xi32>
    %110 = arith.cmpi sgt, %103, %109 : vector<2x1x256xi32>
    %111 = vector.broadcast %110 : vector<2x1x256xi1> to vector<2x16x256xi1>
    %112 = arith.andi %108, %111 : vector<2x16x256xi1>
    %c0_i32_29 = arith.constant 0 : i32
    %113 = vector.shape_cast %2 : vector<2x16x1xi32> to vector<2x16x1xi32>
    %114 = vector.broadcast %113 : vector<2x16x1xi32> to vector<2x16x256xi32>
    %115 = vector.broadcast %c0_i32_29 : i32 to vector<2x16x256xi32>
    %116 = arith.select %112, %114, %115 : vector<2x16x256xi1>, vector<2x16x256xi32>
    %cst_30 = arith.constant dense<0> : vector<2x256xi32>
    %117 = vector.multi_reduction <add>, %116, %cst_30 [1] : vector<2x16x256xi32> to vector<2x256xi32>
    %118 = vector.shape_cast %117 : vector<2x256xi32> to vector<2x1x256xi32>
    %c0_i32_31 = arith.constant 0 : i32
    %119 = vector.broadcast %c0_i32_31 : i32 to vector<2x1x256xi32>
    %120 = arith.cmpi sgt, %103, %119 : vector<2x1x256xi32>
    %c-1_i32_32 = arith.constant -1 : i32
    %121 = vector.broadcast %c-1_i32_32 : i32 to vector<2x1x256xi32>
    %122 = arith.select %120, %118, %121 : vector<2x1x256xi1>, vector<2x1x256xi32>
    %cst_33 = arith.constant 0.000000e+00 : f32
    %123 = vector.shape_cast %99 : vector<2x1x1xi1> to vector<2x1x1xi1>
    %124 = vector.broadcast %123 : vector<2x1x1xi1> to vector<2x1x256xi1>
    %125 = vector.broadcast %cst_33 : f32 to vector<2x1x256xf32>
    %126 = arith.select %124, %125, %53 : vector<2x1x256xi1>, vector<2x1x256xf32>
    %c0_34 = arith.constant 0 : index
    %c0_35 = arith.constant 0 : index
    %c0_36 = arith.constant 0 : index
    %127 = vector.load %arg5[%c0_34, %c0_35, %c0_36] : memref<2x3x256xi32, #tpu.memory_space<vmem>>, vector<2x1x256xi32>
    tpu.vector_store %arg5[%c0_34, %c0_35, %c0_36], %103 {strides = array<i32>} : memref<2x3x256xi32, #tpu.memory_space<vmem>>, vector<2x1x256xi32>,
    %128 = tpu.bitcast %126 : vector<2x1x256xf32> -> vector<2x1x256xi32>
    %c0_37 = arith.constant 0 : index
    %c1 = arith.constant 1 : index
    %c0_38 = arith.constant 0 : index
    %129 = vector.load %arg5[%c0_37, %c1, %c0_38] : memref<2x3x256xi32, #tpu.memory_space<vmem>>, vector<2x1x256xi32>
    tpu.vector_store %arg5[%c0_37, %c1, %c0_38], %128 {strides = array<i32>} : memref<2x3x256xi32, #tpu.memory_space<vmem>>, vector<2x1x256xi32>,
    %c0_39 = arith.constant 0 : index
    %c2 = arith.constant 2 : index
    %c0_40 = arith.constant 0 : index
    %130 = vector.load %arg5[%c0_39, %c2, %c0_40] : memref<2x3x256xi32, #tpu.memory_space<vmem>>, vector<2x1x256xi32>
    tpu.vector_store %arg5[%c0_39, %c2, %c0_40], %122 {strides = array<i32>} : memref<2x3x256xi32, #tpu.memory_space<vmem>>, vector<2x1x256xi32>,
    return
  }
  func.func @transform_0(%arg0: i32) -> (i32, i32, i32) {
    %c0_i32 = arith.constant 0 : i32
    %c0_i32_0 = arith.constant 0 : i32
    %c0_i32_1 = arith.constant 0 : i32
    return %arg0, %c0_i32, %c0_i32_0 : i32, i32, i32
  }
  func.func @transform_1(%arg0: i32) -> (i32, i32, i32) {
    %c0_i32 = arith.constant 0 : i32
    %c0_i32_0 = arith.constant 0 : i32
    %c0_i32_1 = arith.constant 0 : i32
    return %arg0, %c0_i32, %c0_i32_0 : i32, i32, i32
  }
  func.func @transform_2(%arg0: i32) -> (i32, i32, i32) {
    %c0_i32 = arith.constant 0 : i32
    %c0_i32_0 = arith.constant 0 : i32
    %c0_i32_1 = arith.constant 0 : i32
    return %arg0, %c0_i32, %c0_i32_0 : i32, i32, i32
  }
  func.func @transform_3(%arg0: i32) -> (i32, i32, i32) {
    %c0_i32 = arith.constant 0 : i32
    %c0_i32_0 = arith.constant 0 : i32
    %c0_i32_1 = arith.constant 0 : i32
    return %arg0, %c0_i32, %c0_i32_0 : i32, i32, i32
  }
  func.func @transform_4(%arg0: i32) -> (i32, i32, i32) {
    %c0_i32 = arith.constant 0 : i32
    %c0_i32_0 = arith.constant 0 : i32
    %c0_i32_1 = arith.constant 0 : i32
    return %arg0, %c0_i32, %c0_i32_0 : i32, i32, i32
  }
}

</mosaic_0001>

<bundles_post_ra>
// kernel: _assigner_batched.1
= control target key start
LH: loop header
LB: loop body
LE: loop exit
PB: predicated region body
PF: predicated region fallthrough
CT: control target
= control target key end

     0   :  { %v1013_v2 = vmov 2   ;;  %s1014_s19 = smov 2   ;;  %v1015_v5 = vmov 0   ;;  %s1016_s24 = smov 127   ;;  %v1017_v14 = vmov 3   ;;  %v1018_v15 = vmov 1   ;;  %s1622_s2 = inlined_call_operand.vmem [shape: f32[2,16,4], index: 2, kind: input, shape index: {}]   ;;  %s1623_s0 = inlined_call_operand.vmem [shape: s32[2,1,1], index: 0, kind: input, shape index: {}]   ;;  %s1624_s1 = inlined_call_operand.vmem [shape: f32[2,4,256], index: 1, kind: input, shape index: {}]   ;;  %s1625_s3 = inlined_call_operand.vmem [shape: s32[2,16,1], index: 3, kind: input, shape index: {}]   ;;  %s1626_s4 = inlined_call_operand.vmem [shape: s32[2,3,256], index: 4, kind: output, shape index: {}]  }
   0x1   :  { %v19_v0 = vld [vmem:[%s1622_s2] sm:$0xff]  ;;  %v21_v1 = vld [vmem:[%s1622_s2 + $0x10] sm:$0xff]  ;;  %986 = vset.pattern.permute.xlu1 %v1013_v2  ;;  %v20_v3 = vld [vmem:[%s1622_s2 + $0x8] sm:$0xff]  ;;  %988 = vset.pattern.permute.xlu0 %v1015_v5  ;;  %v31_v16 = vlaneseq }
   0x2   :  { %331 = vrot.lane.b32.xlu0 %v19_v0, %s1014_s19  ;;  %335 = vrot.lane.b32.xlu1 %v21_v1, %s1014_s19  ;;  %v22_v4 = vld [vmem:[%s1622_s2 + $0x18] sm:$0xff]  ;;  %v27_v21 = vld [vmem:[%s1623_s0] sm:$0x1] }
   0x3   :  { %v1061_v17 = vshrl.u32 %v31_v16, 7  ;;  %v1076_v27 = vld [vmem:[%s1623_s0 + $0x1] sm:$0x1]  ;;  %vm742_vm4 = vcmp.eq.s32.totalorder %v27_v21, 0  ;;  %v18_v44 = vld [vmem:[%s1624_s1 + $0x8] sm:$0xff]  ;;  %vm1305_vm10 = vcmp.lt.s32.totalorder %v31_v16, 256 }
   0x4   :  { %v744_v36 = vsel %vm742_vm4, 1, %v1015_v5  ;;  %v17_v43 = vld [vmem:[%s1624_s1] sm:$0xff]  ;;  %v316_v49 = vrot.slane %v18_v44, 6  ;;  %v26_v16 = vld [vmem:[%s1625_s3 + $0x18] sm:$0xff]  ;;  %vm743_vm11 = vcmp.eq.s32.totalorder %v1076_v27, 0 }
   0x5   :  { %v1064_v20 = vsub.s32 0, %v1061_v17  ;;  %v1071_v26 = vadd.s32 8, %v1061_v17  ;;  %v1110_v45 = vsub.s32 2, %v1061_v17  ;;  %v1113_v46 = vsub.s32 6, %v1061_v17 }
   0x6   :  { %333 = vrot.lane.b32.xlu0 %v20_v3, %s1014_s19  ;;  %337 = vrot.lane.b32.xlu1 %v22_v4, %s1014_s19  ;;  %v315_v48 = vrot.slane %v17_v43, 6  ;;  %v320_v54 = vsub.f32 %v18_v44, %v316_v49  ;;  %v101_v55 = vsub.s32 4, %v1061_v17  ;;  %v173_v56 = vsub.s32 3, %v1061_v17 }
   0x7   :  { %v471_v25 = vrot.slane %v27_v21, %v1064_v20  ;;  %v475_v31 = vrot.slane %v1076_v27, %v1064_v20  ;;  %v34_v51 = vrot.slane %v17_v43, %v1110_v45  ;;  %v38_v52 = vrot.slane %v17_v43, %v1113_v46 }
   0x8   :  { %v319_v53 = vsub.f32 %v17_v43, %v315_v48  ;;  %v177_v57 = vsub.s32 7, %v1061_v17  ;;  %v42_v59 = vrot.slane %v18_v44, %v1110_v45  ;;  %v46_v60 = vrot.slane %v18_v44, %v1113_v46 }
   0x9   :  { %vm476_vm0 = vcmp.lt.s32.totalorder %v1061_v17, %v471_v25  ;;  %vm477_vm1 = vcmp.lt.s32.totalorder %v1071_v26, %v471_v25  ;;  %vm478_vm2 = vcmp.lt.s32.totalorder %v1061_v17, %v475_v31  ;;  %vm479_vm3 = vcmp.lt.s32.totalorder %v1071_v26, %v475_v31 }
   0xa   :  { %v480_v32 = vsel %vm476_vm0, 1, %v1015_v5  ;;  %v481_v33 = vsel %vm477_vm1, 1, %v1015_v5  ;;  %v482_v34 = vsel %vm478_vm2, 1, %v1015_v5  ;;  %v483_v35 = vsel %vm479_vm3, 1, %v1015_v5 }
   0xb   :  { %v233_v61 = vsub.s32 1, %v1061_v17  ;;  %v237_v62 = vsub.s32 5, %v1061_v17  ;;  %v1131_v63 = vrot.slane %v34_v51, %v1110_v45  ;;  %v1144_v21 = vrot.slane %v46_v60, %v1110_v45 }
  0x74   :  { %v332_v6 = vpop.permute.xlu0 %331  ;;  %v336_v7 = vpop.permute.xlu1 %335 }
  0x75   :  { %v343_v8 = vsub.f32 %v19_v0, %v332_v6  ;;  %v345_v9 = vsub.f32 %v21_v1, %v336_v7  ;;  %v106_v6 = vrot.slane %v18_v44, %v1064_v20  ;;  %v110_v7 = vrot.slane %v18_v44, %v101_v55 }
  0x77   :  { %351 = vrot.lane.b32.xlu0 %v343_v8, %s1016_s24 }
  0x78   :  { %v334_v10 = vpop.permute.xlu0 %333  ;;  %v338_v11 = vpop.permute.xlu1 %337 }
  0x79   :  { %v344_v12 = vsub.f32 %v20_v3, %v334_v10  ;;  %v346_v13 = vsub.f32 %v22_v4, %v338_v11  ;;  %v178_v10 = vrot.slane %v17_v43, %v177_v57  ;;  %v182_v11 = vrot.slane %v18_v44, %v173_v56 }
  0x7b   :  { %355 = vrot.lane.b32.xlu0 %v345_v9, %s1016_s24  ;;  %353 = vrot.lane.b32.xlu1 %v344_v12, %s1016_s24 }
  0x7f   :  { %357 = vrot.lane.b32.xlu1 %v346_v13, %s1016_s24  ;;  %136 = vperm.xlu0 %988, %v20_v3  }
  0x83   :  { %74 = vperm.xlu1 %986, %v20_v3   ;;  %989 = vset.pattern.permute.xlu0 %v1017_v14 }
  0x84   :  { %208 = vperm.xlu0 %989, %v19_v0  }
  0x87   :  { %79 = vperm.xlu1 %986, %v21_v1  }
  0x88   :  { %220 = vperm.xlu0 %989, %v22_v4  }
  0x8b   :  { %987 = vset.pattern.permute.xlu1 %v1015_v5 }
  0x8c   :  { %132 = vperm.xlu1 %987, %v19_v0   ;;  %992 = vset.pattern.permute.xlu0 %v1018_v15 }
  0x8d   :  { %272 = vperm.xlu0 %992, %v20_v3  }
  0x90   :  { %140 = vperm.xlu1 %987, %v21_v1  }
  0x91   :  { %993 = vset.pattern.permute.xlu0 %v1013_v2 }
  0x92   :  { %69 = vperm.xlu0 %993, %v19_v0  }
  0x94   :  { %144 = vperm.xlu1 %987, %v22_v4  }
  0x96   :  { %84 = vperm.xlu0 %993, %v22_v4  }
  0x98   :  { %990 = vset.pattern.permute.xlu1 %v1017_v14  ;;  %v238_v14 = vrot.slane %v17_v43, %v237_v62 }
  0x99   :  { %212 = vperm.xlu1 %990, %v20_v3   ;;  %v98_v3 = vrot.slane %v17_v43, %v1064_v20 }
  0x9b   :  { %v118_v25 = vrot.slane %v98_v3, %v1064_v20 }
  0x9d   :  { %216 = vperm.xlu1 %990, %v21_v1  }
  0xa1   :  { %991 = vset.pattern.permute.xlu1 %v1018_v15  ;;  %v242_v15 = vrot.slane %v18_v44, %v233_v61 }
  0xa2   :  { %268 = vperm.xlu1 %991, %v19_v0   ;;  %v1134_v0 = vrot.slane %v38_v52, %v1110_v45 }
  0xa6   :  { %276 = vperm.xlu1 %991, %v21_v1   ;;  %v967_v1 = vrot.slane %v319_v53, 9 }
  0xaa   :  { %280 = vperm.xlu1 %991, %v22_v4   ;;  %v102_v4 = vrot.slane %v17_v43, %v101_v55 }
  0xae   :  { %994 = vset.pattern.permute.xlu1 %v1013_v2  ;;  %v968_v2 = vrot.slane %v320_v54, 9 }
  0xe9   :  { %v352_v18 = vpop.permute.xlu0 %351 }
  0xea   :  { %v363_v19 = vmul.f32 %v352_v18, %v343_v8  ;;  %v246_v18 = vrot.slane %v18_v44, %v237_v62 }
  0xec   :  { %407 = vperm.xlu0 %993, %v363_v19   ;;  %v1141_v19 = vrot.slane %v42_v59, %v1110_v45  ;;  %v1160_v48 = vrot.slane %v246_v18, %v233_v61 }
  0xed   :  { %v354_v22 = vpop.permute.xlu1 %353  ;;  %v356_v24 = vpop.permute.xlu0 %355 }
  0xee   :  { %v364_v23 = vmul.f32 %v354_v22, %v344_v12  ;;  %v365_v29 = vmul.f32 %v356_v24, %v345_v9  ;;  %v174_v9 = vrot.slane %v17_v43, %v173_v56  ;;  %v186_v12 = vrot.slane %v18_v44, %v177_v57 }
  0xef   :  { %v330_v24 = vmul.f32 %v968_v2, %v320_v54  ;;  %v1158_v44 = vrot.slane %v242_v15, %v233_v61 }
  0xf0   :  { %412 = vperm.xlu1 %994, %v364_v23   ;;  %v329_v23 = vmul.f32 %v967_v1, %v319_v53  ;;  %v194_v31 = vrot.slane %v174_v9, %v173_v56 }
  0xf1   :  { %v358_v28 = vpop.permute.xlu1 %357  ;;  %v380_v52 = vrot.slane %v330_v24, %v1110_v45  ;;  %v384_v53 = vrot.slane %v330_v24, %v1113_v46 }
  0xf2   :  { %v366_v30 = vmul.f32 %v358_v28, %v346_v13  ;;  %v234_v13 = vrot.slane %v17_v43, %v233_v61  ;;  %v122_v28 = vrot.slane %v102_v4, %v1064_v20  ;;  %v258_v43 = vrot.slane %v238_v14, %v233_v61 }
  0xf3   :  { %v372_v49 = vrot.slane %v329_v23, %v1110_v45  ;;  %v376_v51 = vrot.slane %v329_v23, %v1113_v46 }
  0xf4   :  { %422 = vperm.xlu0 %993, %v366_v30   ;;  %417 = vperm.xlu1 %994, %v365_v29   ;;  %v1149_v29 = vrot.slane %v106_v6, %v1064_v20  ;;  %v1152_v30 = vrot.slane %v110_v7, %v1064_v20  ;;  %v1185_v6 = vrot.slane %v380_v52, %v1110_v45 }
  0xf8   :  { %995 = vset.pattern.permute.xlu1 %v1015_v5  ;;  %996 = vset.pattern.permute.xlu0 %v1015_v5 }
  0xf9   :  { %485 = vperm.xlu1 %995, %v480_v32   ;;  %488 = vperm.xlu0 %996, %v481_v33   ;;  %v198_v32 = vrot.slane %v178_v10, %v173_v56  ;;  %v1154_v33 = vrot.slane %v182_v11, %v173_v56 }
  0xfd   :  { %491 = vperm.xlu1 %995, %v482_v34   ;;  %v1156_v34 = vrot.slane %v186_v12, %v173_v56 }
  0xfe   :  { %v1099_v41 = vpop.permute.xlu0 %136 }
  0xff   :  { %v149_v56 = vmax.f32 %v118_v25, %v1099_v41  ;;  %v150_v57 = vmax.f32 %v122_v28, %v1099_v41  ;;  %v1182_v41 = vrot.slane %v376_v51, %v1110_v45 }
 0x101   :  { %494 = vperm.xlu1 %995, %v483_v35  }
 0x102   :  { %v1091_v37 = vpop.permute.xlu1 %74 }
 0x103   :  { %v1115_v47 = vpop.permute.xlu0 %208  ;;  %v89_v54 = vmin.f32 %v1131_v63, %v1091_v37  ;;  %v90_v55 = vmin.f32 %v1134_v0, %v1091_v37  ;;  %v1179_v37 = vrot.slane %v372_v49, %v1110_v45 }
 0x104   :  { %v224_v62 = vmin.f32 %v198_v32, %v1115_v47 }
 0x105   :  { %747 = vperm.xlu1 %995, %v744_v36   ;;  %v254_v36 = vrot.slane %v234_v13, %v233_v61  ;;  %v223_v61 = vmin.f32 %v194_v31, %v1115_v47  ;;  %v157_v12 = vsub.f32 %v89_v54, %v149_v56  ;;  %v158_v13 = vsub.f32 %v90_v55, %v150_v57 }
 0x106   :  { %v1093_v38 = vpop.permute.xlu1 %79 }
 0x107   :  { %v1124_v58 = vpop.permute.xlu0 %220  ;;  %v92_v11 = vmin.f32 %v1144_v21, %v1093_v38  ;;  %v165_v56 = vmax.f32 %v157_v12, 0.0 }
 0x108   :  { %v230_v24 = vmin.f32 %v1156_v34, %v1124_v58 }
 0x10b   :  { %v1095_v39 = vpop.permute.xlu1 %132 }
 0x10c   :  { %v273_v22 = vpop.permute.xlu0 %272  ;;  %v147_v59 = vmax.f32 %v118_v25, %v1095_v39  ;;  %v148_v60 = vmax.f32 %v122_v28, %v1095_v39  ;;  %v1188_v39 = vrot.slane %v384_v53, %v1110_v45 }
 0x10d   :  { %v286_v10 = vmax.f32 %v258_v43, %v273_v22 }
 0x10f   :  { %v1097_v40 = vpop.permute.xlu1 %140 }
 0x110   :  { %v151_v23 = vmax.f32 %v1149_v29, %v1097_v40 }
 0x111   :  { %v70_v1 = vpop.permute.xlu0 %69 }
 0x112   :  { %v87_v3 = vmin.f32 %v1131_v63, %v70_v1  ;;  %v88_v4 = vmin.f32 %v1134_v0, %v70_v1  ;;  %v285_v63 = vmax.f32 %v254_v36, %v273_v22  ;;  %v91_v0 = vmin.f32 %v1141_v19, %v1093_v38 }
 0x113   :  { %v1101_v42 = vpop.permute.xlu1 %144  ;;  %v229_v22 = vmin.f32 %v1154_v33, %v1124_v58 }
 0x114   :  { %v155_v18 = vsub.f32 %v87_v3, %v147_v59  ;;  %v156_v45 = vsub.f32 %v88_v4, %v148_v60  ;;  %v153_v38 = vmax.f32 %v1149_v29, %v1101_v42  ;;  %v154_v25 = vmax.f32 %v1152_v30, %v1101_v42 }
 0x116   :  { %v163_v29 = vmax.f32 %v155_v18, 0.0  ;;  %v164_v52 = vmax.f32 %v156_v45, 0.0 }
 0x118   :  { %v1117_v50 = vpop.permute.xlu1 %212 }
 0x119   :  { %v225_v47 = vmin.f32 %v194_v31, %v1117_v50  ;;  %v226_v7 = vmin.f32 %v198_v32, %v1117_v50  ;;  %v152_v50 = vmax.f32 %v1152_v30, %v1097_v40 }
 0x11b   :  { %v293_v28 = vsub.f32 %v225_v47, %v285_v63  ;;  %v294_v31 = vsub.f32 %v226_v7, %v286_v10  ;;  %v160_v55 = vsub.f32 %v92_v11, %v152_v50 }
 0x11c   :  { %v1138_v8 = vpop.permute.xlu1 %216 }
 0x11d   :  { %v228_v40 = vmin.f32 %v1156_v34, %v1138_v8  ;;  %v301_v59 = vmax.f32 %v293_v28, 0.0  ;;  %v302_v60 = vmax.f32 %v294_v31, 0.0  ;;  %v168_v4 = vmax.f32 %v160_v55, 0.0 }
 0x121   :  { %v269_v35 = vpop.permute.xlu1 %268 }
 0x122   :  { %v283_v46 = vmax.f32 %v254_v36, %v269_v35  ;;  %v284_v2 = vmax.f32 %v258_v43, %v269_v35  ;;  %v85_v35 = vpop.permute.xlu0 %84  ;;  %v227_v36 = vmin.f32 %v1154_v33, %v1138_v8  ;;  %v159_v33 = vsub.f32 %v91_v0, %v151_v23 }
 0x123   :  { %v93_v53 = vmin.f32 %v1141_v19, %v85_v35  ;;  %v94_v54 = vmin.f32 %v1144_v21, %v85_v35  ;;  %v166_v8 = vmax.f32 %v158_v13, 0.0  ;;  %v309_v0 = vmul.f32 %v301_v59, %v165_v56 }
 0x124   :  { %v291_v14 = vsub.f32 %v223_v61, %v283_v46  ;;  %v292_v15 = vsub.f32 %v224_v62, %v284_v2  ;;  %v167_v21 = vmax.f32 %v159_v33, 0.0 }
 0x125   :  { %v277_v9 = vpop.permute.xlu1 %276  ;;  %v161_v19 = vsub.f32 %v93_v53, %v153_v38  ;;  %v162_v3 = vsub.f32 %v94_v54, %v154_v25  ;;  %v310_v11 = vmul.f32 %v302_v60, %v166_v8 }
 0x126   :  { %v287_v43 = vmax.f32 %v1158_v44, %v277_v9  ;;  %v288_v58 = vmax.f32 %v1160_v48, %v277_v9  ;;  %v299_v49 = vmax.f32 %v291_v14, 0.0  ;;  %v300_v51 = vmax.f32 %v292_v15, 0.0 }
 0x127   :  { %v169_v23 = vmax.f32 %v161_v19, 0.0  ;;  %v170_v50 = vmax.f32 %v162_v3, 0.0 }
 0x128   :  { %v295_v34 = vsub.f32 %v227_v36, %v287_v43  ;;  %v296_v57 = vsub.f32 %v228_v40, %v288_v58  ;;  %v307_v62 = vmul.f32 %v299_v49, %v163_v29  ;;  %v308_v1 = vmul.f32 %v300_v51, %v164_v52 }
 0x129   :  { %v281_v32 = vpop.permute.xlu1 %280 }
 0x12a   :  { %v289_v42 = vmax.f32 %v1158_v44, %v281_v32  ;;  %v290_v30 = vmax.f32 %v1160_v48, %v281_v32  ;;  %v303_v9 = vmax.f32 %v295_v34, 0.0  ;;  %v304_v63 = vmax.f32 %v296_v57, 0.0 }
 0x12c   :  { %v297_v48 = vsub.f32 %v229_v22, %v289_v42  ;;  %v298_v2 = vsub.f32 %v230_v24, %v290_v30  ;;  %v311_v25 = vmul.f32 %v303_v9, %v167_v21  ;;  %v312_v28 = vmul.f32 %v304_v63, %v168_v4 }
 0x12e   :  { %v305_v18 = vmax.f32 %v297_v48, 0.0  ;;  %v306_v45 = vmax.f32 %v298_v2, 0.0 }
 0x130   :  { %v313_v40 = vmul.f32 %v305_v18, %v169_v23 }
 0x16b   :  { %v408_v61 = vpop.permute.xlu0 %407 }
 0x16c   :  { %v425_v46 = vadd.f32 %v408_v61, %v1179_v37  ;;  %v426_v44 = vadd.f32 %v408_v61, %v1182_v41 }
 0x16e   :  { %v433_v47 = vsub.f32 %v425_v46, %v307_v62  ;;  %v434_v7 = vsub.f32 %v426_v44, %v308_v1 }
 0x16f   :  { %v413_v10 = vpop.permute.xlu1 %412 }
 0x170   :  { %v441_v12 = vmax.f32 %v433_v47, 1e-06  ;;  %v442_v13 = vmax.f32 %v434_v7, 1e-06  ;;  %v427_v14 = vadd.f32 %v413_v10, %v1179_v37  ;;  %v428_v15 = vadd.f32 %v413_v10, %v1182_v41 }
 0x171   :  { %v314_v41 = vmul.f32 %v306_v45, %v170_v50 }
 0x172   :  { %997 = vrcp.f32 %v441_v12  ;;  %v435_v22 = vsub.f32 %v427_v14, %v309_v0  ;;  %v436_v24 = vsub.f32 %v428_v15, %v310_v11 }
 0x173   :  { %999 = vrcp.f32 %v442_v13  ;;  %v418_v38 = vpop.permute.xlu1 %417  ;;  %v423_v31 = vpop.permute.xlu0 %422 }
 0x174   :  { %v443_v32 = vmax.f32 %v435_v22, 1e-06  ;;  %v444_v35 = vmax.f32 %v436_v24, 1e-06  ;;  %v429_v36 = vadd.f32 %v418_v38, %v1185_v6  ;;  %v430_v37 = vadd.f32 %v418_v38, %v1188_v39 }
 0x175   :  { %v431_v43 = vadd.f32 %v423_v31, %v1185_v6  ;;  %v432_v58 = vadd.f32 %v423_v31, %v1188_v39  ;;  %v1019_v22 = vmov 1966171168  }
 0x176   :  { %1001 = vrcp.f32 %v443_v32  ;;  %v437_v49 = vsub.f32 %v429_v36, %v311_v25  ;;  %v438_v51 = vsub.f32 %v430_v37, %v312_v28  ;;  %v856_v24 = vunpack.c.l.s4 %v1019_v22 }
 0x177   :  { %1003 = vrcp.f32 %v444_v35  ;;  %v439_v29 = vsub.f32 %v431_v43, %v313_v40  ;;  %v440_v52 = vsub.f32 %v432_v58, %v314_v41 }
 0x178   :  { %v445_v42 = vmax.f32 %v437_v49, 1e-06  ;;  %v446_v30 = vmax.f32 %v438_v51, 1e-06  ;;  %v1226_v53 = vpop.permute.xlu1 %485  ;;  %v1229_v39 = vpop.permute.xlu0 %488  ;;  %v1635_v51 = vmov 0 }
 0x179   :  { %v447_v54 = vmax.f32 %v439_v29, 1e-06  ;;  %v448_v33 = vmax.f32 %v440_v52, 1e-06  ;;  %vm1627_vm5 = vcmp.eq.s32.totalorder %v1226_v53, 1  ;;  %vm1630_vm6 = vcmp.eq.s32.totalorder %v1229_v39, 1 }
 0x17a   :  { %1005 = vrcp.f32 %v445_v42 }
 0x17b   :  { %1007 = vrcp.f32 %v446_v30 }
 0x17c   :  { %v998_v55 = vpop.eup %997  ;;  %1009 = vrcp.f32 %v447_v54  ;;  %v1231_v8 = vpop.permute.xlu1 %491  ;;  %v23_v54 = vld [vmem:[%s1625_s3] sm:$0xff] }
 0x17d   :  { %v1000_v6 = vpop.eup %999  ;;  %1011 = vrcp.f32 %v448_v33  ;;  %v457_v56 = vmul.f32 %v998_v55, %v307_v62  ;;  %vm1629_vm7 = vcmp.eq.s32.totalorder %v1231_v8, 1  ;;  %v1637_v55 = vmov 0 }
 0x17e   :  { %v458_v34 = vmul.f32 %v1000_v6, %v308_v1  ;;  %v1638_v55 = vsel %vm1305_vm10, 4294967295, %v1637_v55 }
 0x17f   :  { %v1235_v57 = vsel %vm1627_vm5, %v457_v56, -1.0  ;;  %v24_v56 = vld [vmem:[%s1625_s3 + $0x8] sm:$0xff] }
 0x180   :  { %v1002_v59 = vpop.eup %1001  ;;  %v1240_v60 = vsel %vm1627_vm5, %v458_v34, -1.0  ;;  %v1248_v2 = vpop.permute.xlu1 %494  ;;  %v745_v34 = vsel %vm743_vm11, 1, %v1015_v5 }
 0x181   :  { %v1004_v61 = vpop.eup %1003  ;;  %v459_v46 = vmul.f32 %v1002_v59, %v309_v0  ;;  %v604_v44 = vmax.f32 %v1235_v57, %v1240_v60  ;;  %vm1628_vm8 = vcmp.eq.s32.totalorder %v1248_v2, 1  ;;  %v25_v59 = vld [vmem:[%s1625_s3 + $0x10] sm:$0xff] }
 0x182   :  { %v460_v62 = vmul.f32 %v1004_v61, %v310_v11 }
 0x183   :  { %v1246_v1 = vsel %vm1630_vm6, %v459_v46, -1.0  ;;  %605 = vmax.xlane.f32.xlu0 %v604_v44 }
 0x184   :  { %v1006_v48 = vpop.eup %1005  ;;  %v1252_v19 = vsel %vm1630_vm6, %v460_v62, -1.0  ;;  %v508_v3 = vmax.f32 %v1235_v57, %v1246_v1  ;;  %v748_v38 = vpop.permute.xlu1 %747 }
 0x185   :  { %v1008_v21 = vpop.eup %1007  ;;  %v515_v4 = vmax.f32 %v1240_v60, %v1252_v19  ;;  %v607_v47 = vmax.f32 %v1246_v1, %v1252_v19  ;;  %v461_v7 = vmul.f32 %v1006_v48, %v311_v25  ;;  %v752_v36 = vrot.slane %v748_v38, %v1064_v20 }
 0x186   :  { %v1010_v9 = vpop.eup %1009  ;;  %v509_v63 = vrot.slane %v508_v3, 4  ;;  %v462_v10 = vmul.f32 %v1008_v21, %v312_v28 }
 0x187   :  { %v1012_v0 = vpop.eup %1011  ;;  %v516_v11 = vrot.slane %v515_v4, 4  ;;  %608 = vmax.xlane.f32.xlu1 %v607_v47  ;;  %v1263_v12 = vsel %vm1629_vm7, %v461_v7, -1.0  ;;  %v463_v13 = vmul.f32 %v1010_v9, %v313_v40  ;;  %vm1287_vm9 = vcmp.eq.s32.totalorder %v752_v36, 1 }
 0x188   :  { %v510_v14 = vmax.f32 %v508_v3, %v509_v63  ;;  %v1267_v15 = vsel %vm1629_vm7, %v462_v10, -1.0  ;;  %v464_v18 = vmul.f32 %v1012_v0, %v314_v41  ;;  %v857_v41 = vunpack.c.0.s8 %v856_v24 }
 0x189   :  { %v517_v45 = vmax.f32 %v515_v4, %v516_v11  ;;  %v610_v23 = vmax.f32 %v1263_v12, %v1267_v15  ;;  %v1274_v25 = vsel %vm1628_vm8, %v463_v13, -1.0  ;;  %v1636_v51 = vsel %vm1287_vm9, 4294967295, %v1635_v51 }
 0x18a   :  { %v511_v50 = vrot.slane %v510_v14, 2  ;;  %v1278_v28 = vsel %vm1628_vm8, %v464_v18, -1.0  ;;  %v1292_v29 = vsub.s32 %v857_v41, %v1061_v17  ;;  %v522_v46 = vmax.f32 %v1263_v12, %v1274_v25 }
 0x18b   :  { %v518_v31 = vrot.slane %v517_v45, 2  ;;  %611 = vmax.xlane.f32.xlu0 %v610_v23  ;;  %v613_v37 = vmax.f32 %v1274_v25, %v1278_v28  ;;  %v529_v61 = vmax.f32 %v1267_v15, %v1278_v28 }
 0x18c   :  { %v512_v32 = vmax.f32 %v510_v14, %v511_v50  ;;  %v523_v62 = vrot.slane %v522_v46, 4 }
 0x18d   :  { %v519_v35 = vmax.f32 %v517_v45, %v518_v31  ;;  %v530_v44 = vrot.slane %v529_v61, 4 }
 0x18e   :  { %v513_v40 = vrot.slane %v512_v32, 1  ;;  %v524_v3 = vmax.f32 %v522_v46, %v523_v62 }
 0x18f   :  { %v520_v43 = vrot.slane %v519_v35, 1  ;;  %614 = vmax.xlane.f32.xlu0 %v613_v37  ;;  %v531_v48 = vmax.f32 %v529_v61, %v530_v44  ;;  %v1643_v61 = vmov 0  ;;  %v1401_v44 = vadd.s32 1, %v1061_v17 }
 0x190   :  { %v1283_v58 = vmax.f32 %v512_v32, %v513_v40  ;;  %v525_v21 = vrot.slane %v524_v3, 2 }
 0x191   :  { %v1285_v49 = vmax.f32 %v519_v35, %v520_v43  ;;  %v532_v27 = vrot.slane %v531_v48, 2 }
 0x192   :  { %v850_v52 = vsel %vm1287_vm9, 0.0, %v1283_v58  ;;  %v526_v5 = vmax.f32 %v524_v3, %v525_v21  ;;  %vm536_vm12 = vcmp.eq.f32.partialorder %v1235_v57, %v1283_v58  ;;  %vm538_vm13 = vcmp.eq.f32.partialorder %v1246_v1, %v1283_v58 }
 0x193   :  { %v851_v42 = vsel %vm1287_vm9, 0.0, %v1285_v49  ;;  %v533_v4 = vmax.f32 %v531_v48, %v532_v27  ;;  %vm537_vm14 = vcmp.eq.f32.partialorder %v1240_v60, %v1285_v49  ;;  %vm544_vm15 = vmand %vm536_vm12, %vm1627_vm5  ;;  %vm539_vm0 = vcmp.eq.f32.partialorder %v1252_v19, %v1285_v49 }
 0x194   :  { %v895_v30 = vcombine.low %v850_v52, %v851_v42  ;;  %v527_v7 = vrot.slane %v526_v5, 1  ;;  %vm546_vm1 = vmand %vm538_vm13, %vm1630_vm6  ;;  %v552_v10 = vsel %vm544_vm15, %v1061_v17, 16  ;;  %v1649_v48 = vmov 0 }
 0x195   :  { %v534_v47 = vrot.slane %v533_v4, 1  ;;  %vm545_vm2 = vmand %vm537_vm14, %vm1627_vm5  ;;  %v554_v0 = vsel %vm546_vm1, %v1071_v26, 16 }
 0x196   :  { %v902_v33 = vrot.slane %v895_v30, %v1292_v29  ;;  %v1340_v63 = vmax.f32 %v526_v5, %v527_v7  ;;  %vm547_vm11 = vmand %vm539_vm0, %vm1630_vm6  ;;  %v553_v11 = vsel %vm545_vm2, %v1061_v17, 16  ;;  %vm560_vm5 = vcmp.lt.s32.totalorder %v552_v10, %v554_v0 }
 0x197   :  { %v1334_v9 = vmax.f32 %v533_v4, %v534_v47  ;;  %v555_v13 = vsel %vm547_vm11, %v1071_v26, 16  ;;  %v561_v45 = vsel %vm560_vm5, %v552_v10, %v554_v0  ;;  %v1020_v5 = vmov 4294967295  }
 0x198   :  { %v909_v6 = vrot.slane %v902_v33, %v1292_v29  ;;  %799 = vperm.xlu1 %995, %v23_v54   ;;  %vm540_vm12 = vcmp.eq.f32.partialorder %v1263_v12, %v1340_v63  ;;  %vm542_vm14 = vcmp.eq.f32.partialorder %v1274_v25, %v1340_v63  ;;  %v562_v22 = vrot.slane %v561_v45, 4 }
 0x199   :  { %vm541_vm3 = vcmp.eq.f32.partialorder %v1267_v15, %v1334_v9  ;;  %vm543_vm4 = vcmp.eq.f32.partialorder %v1278_v28, %v1334_v9  ;;  %vm548_vm0 = vmand %vm540_vm12, %vm1629_vm7 }
 0x19a   :  { %974 = vst.msk [vmem:[%s1626_s4 + $0x1] ss:$4 sm:$0x3] %vm1305_vm10, %v909_v6  ;;  %vm549_vm13 = vmand %vm541_vm3, %vm1629_vm7  ;;  %vm571_vm3 = vcmp.lt.s32.totalorder %v553_v11, %v555_v13  ;;  %v556_v23 = vsel %vm548_vm0, %v1061_v17, 16  ;;  %vm563_vm11 = vcmp.lt.s32.totalorder %v561_v45, %v562_v22  ;;  %vm710_vm0 = vcmp.lt.f32.partialorder %v1283_v58, 0.5 }
 0x19b   :  { %vm551_vm15 = vmand %vm543_vm4, %vm1628_vm8  ;;  %v557_v14 = vsel %vm549_vm13, %v1061_v17, 16  ;;  %v572_v24 = vsel %vm571_vm3, %v553_v11, %v555_v13  ;;  %v564_v36 = vsel %vm563_vm11, %v561_v45, %v562_v22  ;;  %vm707_vm3 = vcmp.ge.f32.partialorder %v1285_v49, 0.0 }
 0x19c   :  { %802 = vperm.xlu1 %995, %v24_v56   ;;  %vm550_vm1 = vmand %vm542_vm14, %vm1628_vm8  ;;  %v559_v18 = vsel %vm551_vm15, %v1071_v26, 16  ;;  %v573_v31 = vrot.slane %v572_v24, 4  ;;  %v565_v40 = vrot.slane %v564_v36, 2  ;;  %vm706_vm15 = vcmp.ge.f32.partialorder %v1283_v58, 0.0 }
 0x19d   :  { %v558_v50 = vsel %vm550_vm1, %v1071_v26, 16  ;;  %vm593_vm2 = vcmp.lt.s32.totalorder %v557_v14, %v559_v18  ;;  %vm713_vm11 = vcmp.lt.f32.partialorder %v1334_v9, 0.5 }
 0x19e   :  { %vm582_vm4 = vcmp.lt.s32.totalorder %v556_v23, %v558_v50  ;;  %v594_v38 = vsel %vm593_vm2, %v557_v14, %v559_v18  ;;  %vm574_vm12 = vcmp.lt.s32.totalorder %v572_v24, %v573_v31  ;;  %vm566_vm14 = vcmp.lt.s32.totalorder %v564_v36, %v565_v40 }
 0x19f   :  { %v583_v32 = vsel %vm582_vm4, %v556_v23, %v558_v50  ;;  %v595_v35 = vrot.slane %v594_v38, 4  ;;  %v575_v41 = vsel %vm574_vm12, %v572_v24, %v573_v31  ;;  %v567_v54 = vsel %vm566_vm14, %v564_v36, %v565_v40  ;;  %vm1380_vm12 = vmand %vm706_vm15, %vm710_vm0 }
 0x1a0   :  { %808 = vperm.xlu1 %995, %v26_v16   ;;  %v584_v37 = vrot.slane %v583_v32, 4  ;;  %v576_v52 = vrot.slane %v575_v41, 2  ;;  %vm711_vm2 = vcmp.lt.f32.partialorder %v1285_v49, 0.5  ;;  %vm709_vm4 = vcmp.ge.f32.partialorder %v1334_v9, 0.0 }
 0x1a1   :  { %vm596_vm13 = vcmp.lt.s32.totalorder %v594_v38, %v595_v35  ;;  %v568_v16 = vrot.slane %v567_v54, 1  ;;  %vm1391_vm10 = vmand %vm709_vm4, %vm713_vm11  ;;  %vm712_vm15 = vcmp.lt.f32.partialorder %v1340_v63, 0.5  ;;  %vm1645_vm0 = vcmp.eq.s32.totalorder %v1226_v53, 1 }
 0x1a2   :  { %vm585_vm5 = vcmp.lt.s32.totalorder %v583_v32, %v584_v37  ;;  %v597_v43 = vsel %vm596_vm13, %v594_v38, %v595_v35  ;;  %vm577_vm1 = vcmp.lt.s32.totalorder %v575_v41, %v576_v52  ;;  %vm1384_vm13 = vmand %vm707_vm3, %vm711_vm2  ;;  %v1644_v61 = vsel %vm1391_vm10, 4294967295, %v1643_v61 }
 0x1a3   :  { %v586_v42 = vsel %vm585_vm5, %v583_v32, %v584_v37  ;;  %v598_v30 = vrot.slane %v597_v43, 2  ;;  %vm1646_vm2 = vmmov %vm1645_vm0  ;;  %vm1410_vm4 = vcmp.lt.s32.totalorder %v567_v54, %v568_v16  ;;  %v718_v47 = vsel %vm1380_vm12, 0, %v1020_v5 }
 0x1a4   :  { %v587_v33 = vrot.slane %v586_v42, 2  ;;  %v1650_v48 = vsel %vm1410_vm4, 4294967295, %v1649_v48  ;;  %v1434_v7 = vsel %vm1384_vm13, 0, %v1020_v5 }
 0x1a5   :  { %754 = vperm.xlu0 %996, %v745_v34   ;;  %v578_v34 = vsel %vm577_vm1, %v575_v41, %v576_v52  ;;  %vm599_vm5 = vcmp.lt.s32.totalorder %v597_v43, %v598_v30 }
 0x1a6   :  { %vm588_vm3 = vcmp.lt.s32.totalorder %v586_v42, %v587_v33  ;;  %v600_v46 = vsel %vm599_vm5, %v597_v43, %v598_v30  ;;  %v579_v3 = vrot.slane %v578_v34, 1 }
 0x1a7   :  { %v589_v21 = vsel %vm588_vm3, %v586_v42, %v587_v33  ;;  %v601_v4 = vrot.slane %v600_v46, 1 }
 0x1a8   :  { %vm1441_vm3 = vcmp.lt.s32.totalorder %v578_v34, %v579_v3  ;;  %v590_v0 = vrot.slane %v589_v21, 1 }
 0x1a9   :  { %805 = vperm.xlu0 %996, %v25_v59   ;;  %v581_v22 = vsel %vm1441_vm3, %v578_v34, %v579_v3  ;;  %vm1670_vm3 = vcmp.eq.s32.totalorder %v1248_v2, 1 }
 0x1aa   :  { %v727_v36 = vadd.s32 1, %v581_v22 }
 0x210   :  { %v606_v56 = vpop.xlane.xlu0 %605 }
 0x211   :  { %vm616_vm8 = vcmp.eq.f32.partialorder %v1235_v57, %v606_v56  ;;  %vm617_vm7 = vcmp.eq.f32.partialorder %v1240_v60, %v606_v56  ;;  %vm632_vm6 = vcmp.ge.f32.partialorder %v606_v56, 0.5  ;;  %v1408_v60 = vadd.s32 1, %v1071_v26 }
 0x212   :  { %vm624_vm1 = vmand %vm616_vm8, %vm1645_vm0  ;;  %vm1651_vm8 = vcmp.ge.f32.partialorder %v1340_v63, 0.0 }
 0x213   :  { %vm625_vm9 = vmand %vm617_vm7, %vm1646_vm2  ;;  %vm1656_vm2 = vcmp.eq.s32.totalorder %v1229_v39, 1 }
 0x214   :  { %vm1403_vm14 = vmand %vm624_vm1, %vm632_vm6  ;;  %v609_v62 = vpop.xlane.xlu1 %608 }
 0x215   :  { %vm1416_vm7 = vmand %vm1651_vm8, %vm712_vm15  ;;  %vm618_vm5 = vcmp.eq.f32.partialorder %v1246_v1, %v609_v62  ;;  %vm619_vm0 = vcmp.eq.f32.partialorder %v1252_v19, %v609_v62  ;;  %vm633_vm1 = vcmp.ge.f32.partialorder %v609_v62, 0.5  ;;  %v654_v1 = vsel %vm1403_vm14, %v1401_v44, 0 }
 0x216   :  { %vm1420_vm11 = vmand %vm625_vm9, %vm632_vm6  ;;  %vm1658_vm9 = vnez %v1650_v48  ;;  %vm1661_vm14 = vcmp.eq.s32.totalorder %v1231_v8, 1 }
 0x217   :  { %vm626_vm10 = vmand %vm618_vm5, %vm1656_vm2  ;;  %v570_v10 = vsel %vm1658_vm9, %v567_v54, %v568_v16  ;;  %v655_v13 = vsel %vm1420_vm11, %v1401_v44, 0  ;;  %vm1665_vm9 = vnez %v1644_v61 }
 0x218   :  { %vm1657_vm4 = vmmov %vm1656_vm2  ;;  %v612_v19 = vpop.xlane.xlu0 %611  ;;  %v726_v24 = vadd.s32 1, %v570_v10 }
 0x219   :  { %vm627_vm15 = vmand %vm619_vm0, %vm1657_vm4  ;;  %vm620_vm12 = vcmp.eq.f32.partialorder %v1263_v12, %v612_v19  ;;  %vm621_vm13 = vcmp.eq.f32.partialorder %v1267_v15, %v612_v19  ;;  %vm634_vm8 = vcmp.ge.f32.partialorder %v612_v19, 0.5  ;;  %vm1454_vm0 = vcmp.lt.s32.totalorder %v600_v46, %v601_v4 }
 0x21a   :  { %vm646_vm6 = vmand %vm626_vm10, %vm633_vm1  ;;  %v721_v12 = vsel %vm1665_vm9, 0, %v1020_v5  ;;  %v603_v32 = vsel %vm1454_vm0, %v600_v46, %v601_v4  ;;  %vm591_vm9 = vcmp.lt.s32.totalorder %v589_v21, %v590_v0 }
 0x21b   :  { %vm647_vm4 = vmand %vm627_vm15, %vm633_vm1  ;;  %v656_v11 = vsel %vm646_vm6, %v1408_v60, 0  ;;  %vm722_vm6 = vcmp.ge.f32.partialorder %v1283_v58, 0.5  ;;  %v729_v41 = vadd.s32 1, %v603_v32  ;;  %v592_v42 = vsel %vm591_vm9, %v589_v21, %v590_v0 }
 0x21c   :  { %v657_v14 = vsel %vm647_vm4, %v1408_v60, 0  ;;  %vm662_vm10 = vcmp.gt.s32.totalorder %v654_v1, %v656_v11  ;;  %vm628_vm5 = vmand %vm620_vm12, %vm1661_vm14  ;;  %v615_v8 = vpop.xlane.xlu0 %614  ;;  %v730_v40 = vsel %vm722_vm6, %v726_v24, %v718_v47  ;;  %v728_v62 = vadd.s32 1, %v592_v42 }
 0x21d   :  { %v663_v45 = vsel %vm662_vm10, %v654_v1, %v656_v11  ;;  %vm673_vm1 = vcmp.gt.s32.totalorder %v655_v13, %v657_v14  ;;  %vm1664_vm2 = vmmov %vm1661_vm14  ;;  %vm623_vm10 = vcmp.eq.f32.partialorder %v1278_v28, %v615_v8 }
 0x21e   :  { %vm629_vm15 = vmand %vm621_vm13, %vm1664_vm2  ;;  %v664_v15 = vrot.slane %v663_v45, 4  ;;  %v674_v23 = vsel %vm673_vm1, %v655_v13, %v657_v14  ;;  %vm622_vm13 = vcmp.eq.f32.partialorder %v1274_v25, %v615_v8  ;;  %vm635_vm1 = vcmp.ge.f32.partialorder %v615_v8, 0.5 }
 0x21f   :  { %vm1464_vm11 = vmand %vm628_vm5, %vm634_vm8  ;;  %v675_v38 = vrot.slane %v674_v23, 4  ;;  %vm725_vm2 = vcmp.ge.f32.partialorder %v1334_v9, 0.5  ;;  %v1487_v25 = vsel %vm1416_vm7, 0, %v1020_v5 }
 0x220   :  { %vm1472_vm12 = vmand %vm629_vm15, %vm634_vm8  ;;  %vm665_vm14 = vcmp.gt.s32.totalorder %v663_v45, %v664_v15  ;;  %v658_v52 = vsel %vm1464_vm11, %v1401_v44, 0  ;;  %vm1672_vm11 = vcmp.ge.f32.partialorder %v1285_v49, 0.5 }
 0x221   :  { %vm630_vm5 = vmand %vm622_vm13, %vm1670_vm3  ;;  %v666_v35 = vsel %vm665_vm14, %v663_v45, %v664_v15  ;;  %vm676_vm8 = vcmp.gt.s32.totalorder %v674_v23, %v675_v38  ;;  %v659_v30 = vsel %vm1472_vm12, %v1401_v44, 0  ;;  %v731_v46 = vsel %vm1672_vm11, %v727_v36, %v1434_v7  ;;  %v800_v7 = vpop.permute.xlu1 %799 }
 0x222   :  { %vm1671_vm15 = vmmov %vm1670_vm3  ;;  %v667_v28 = vrot.slane %v666_v35, 2  ;;  %v677_v37 = vsel %vm676_vm8, %v674_v23, %v675_v38  ;;  %vm724_vm3 = vcmp.ge.f32.partialorder %v1340_v63, 0.5 }
 0x223   :  { %vm631_vm4 = vmand %vm623_vm10, %vm1671_vm15  ;;  %v678_v43 = vrot.slane %v677_v37, 2  ;;  %v732_v23 = vsel %vm724_vm3, %v728_v62, %v1487_v25 }
 0x224   :  { %vm650_vm0 = vmand %vm630_vm5, %vm635_vm1  ;;  %vm668_vm7 = vcmp.gt.s32.totalorder %v666_v35, %v667_v28  ;;  %v755_v59 = vpop.permute.xlu0 %754 }
 0x225   :  { %vm651_vm13 = vmand %vm631_vm4, %vm635_vm1  ;;  %v660_v2 = vsel %vm650_vm0, %v1408_v60, 0  ;;  %v669_v54 = vsel %vm668_vm7, %v666_v35, %v667_v28  ;;  %vm679_vm10 = vcmp.gt.s32.totalorder %v677_v37, %v678_v43  ;;  %v759_v44 = vrot.slane %v755_v59, %v1064_v20  ;;  %v803_v8 = vpop.permute.xlu1 %802 }
 0x226   :  { %v661_v58 = vsel %vm651_vm13, %v1408_v60, 0  ;;  %vm684_vm6 = vcmp.gt.s32.totalorder %v658_v52, %v660_v2  ;;  %v670_v6 = vrot.slane %v669_v54, 1  ;;  %v680_v56 = vsel %vm679_vm10, %v677_v37, %v678_v43 }
 0x227   :  { %v685_v33 = vsel %vm684_vm6, %v658_v52, %v660_v2  ;;  %vm695_vm14 = vcmp.gt.s32.totalorder %v659_v30, %v661_v58  ;;  %v681_v61 = vrot.slane %v680_v56, 1  ;;  %v733_v60 = vsel %vm725_vm2, %v729_v41, %v721_v12 }
 0x228   :  { %v686_v16 = vrot.slane %v685_v33, 4  ;;  %v696_v34 = vsel %vm695_vm14, %v659_v30, %v661_v58  ;;  %vm671_vm4 = vcmp.gt.s32.totalorder %v669_v54, %v670_v6  ;;  %vm1508_vm15 = vcmp.eq.s32.totalorder %v759_v44, 1 }
 0x229   :  { %v697_v57 = vrot.slane %v696_v34, 4  ;;  %v672_v48 = vsel %vm671_vm4, %v669_v54, %v670_v6  ;;  %vm682_vm5 = vcmp.gt.s32.totalorder %v680_v56, %v681_v61  ;;  %vm1675_vm2 = vnez %v1636_v51 }
 0x22a   :  { %vm687_vm12 = vcmp.gt.s32.totalorder %v685_v33, %v686_v16  ;;  %v683_v53 = vsel %vm682_vm5, %v680_v56, %v681_v61  ;;  %vm734_vm9 = vcmp.gt.s32.totalorder %v672_v48, 0  ;;  %v852_v1 = vsel %vm1508_vm15, 0.0, %v1340_v63  ;;  %v809_v61 = vpop.permute.xlu1 %808 }
 0x22b   :  { %v688_v3 = vsel %vm687_vm12, %v685_v33, %v686_v16  ;;  %vm698_vm1 = vcmp.gt.s32.totalorder %v696_v34, %v697_v57  ;;  %vm735_vm8 = vcmp.gt.s32.totalorder %v683_v53, 0  ;;  %v738_v21 = vsel %vm734_vm9, %v672_v48, %v730_v40 }
 0x22c   :  { %v689_v27 = vrot.slane %v688_v3, 2  ;;  %v699_v49 = vsel %vm698_vm1, %v696_v34, %v697_v57  ;;  %v739_v5 = vsel %vm735_vm8, %v683_v53, %v731_v46  ;;  %v1514_v47 = vsel %vm1675_vm2, 0, %v738_v21  ;;  %v806_v34 = vpop.permute.xlu0 %805 }
 0x22d   :  { %v700_v4 = vrot.slane %v699_v49, 2  ;;  %v1521_v19 = vsel %vm1675_vm2, 0, %v739_v5  ;;  %v969_v10 = vadd.s32 4294967295, %v1514_v47  ;;  %vm778_vm13 = vcmp.gt.s32.totalorder %v1514_v47, 0 }
 0x22e   :  { %vm690_vm0 = vcmp.gt.s32.totalorder %v688_v3, %v689_v27  ;;  %v970_v39 = vadd.s32 4294967295, %v1521_v19  ;;  %vm779_vm6 = vcmp.gt.s32.totalorder %v1521_v19, 0  ;;  %v854_v0 = vcombine.low %v1514_v47, %v1521_v19 }
 0x22f   :  { %vm701_vm7 = vcmp.gt.s32.totalorder %v699_v49, %v700_v4  ;;  %v691_v11 = vsel %vm690_vm0, %v688_v3, %v689_v27  ;;  %vm770_vm10 = vcmp.eq.s32.totalorder %v1061_v17, %v969_v10  ;;  %vm772_vm14 = vcmp.eq.s32.totalorder %v1071_v26, %v969_v10 }
 0x230   :  { %v692_v51 = vrot.slane %v691_v11, 1  ;;  %v702_v13 = vsel %vm701_vm7, %v699_v49, %v700_v4  ;;  %vm771_vm11 = vcmp.eq.s32.totalorder %v1061_v17, %v970_v39  ;;  %vm1534_vm4 = vmand %vm770_vm10, %vm778_vm13  ;;  %v861_v18 = vrot.slane %v854_v0, %v1292_v29 }
 0x231   :  { %vm773_vm12 = vcmp.eq.s32.totalorder %v1071_v26, %v970_v39  ;;  %v703_v45 = vrot.slane %v702_v13, 1  ;;  %vm1542_vm5 = vmand %vm771_vm11, %vm779_vm6  ;;  %v810_v15 = vsel %vm1534_vm4, %v800_v7, 0  ;;  %v853_v50 = vsel %vm1508_vm15, 0.0, %v1334_v9 }
 0x232   :  { %vm693_vm1 = vcmp.gt.s32.totalorder %v691_v11, %v692_v51  ;;  %v868_v22 = vrot.slane %v861_v18, %v1292_v29  ;;  %v811_v24 = vsel %vm1542_vm5, %v800_v7, 0  ;;  %vm792_vm9 = vmand %vm772_vm14, %vm778_vm13  ;;  %v910_v9 = vcombine.low %v852_v1, %v853_v50 }
 0x233   :  { %v694_v38 = vsel %vm693_vm1, %v691_v11, %v692_v51  ;;  %vm704_vm8 = vcmp.gt.s32.totalorder %v702_v13, %v703_v45  ;;  %vm793_vm3 = vmand %vm773_vm12, %vm779_vm6  ;;  %v812_v63 = vsel %vm792_vm9, %v803_v8, 0  ;;  %vm1680_vm0 = vnez %v1638_v55 }
 0x234   :  { %v705_v31 = vsel %vm704_vm8, %v702_v13, %v703_v45  ;;  %vm736_vm2 = vcmp.gt.s32.totalorder %v694_v38, 0  ;;  %888 = vst.msk [vmem:[%s1626_s4] ss:$4 sm:$0x3] %vm1680_vm0, %v868_v22  ;;  %v813_v32 = vsel %vm793_vm3, %v803_v8, 0  ;;  %v818_v35 = vadd.s32 %v812_v63, %v810_v15 }
 0x235   :  { %vm737_vm7 = vcmp.gt.s32.totalorder %v705_v31, 0  ;;  %v740_v36 = vsel %vm736_vm2, %v694_v38, %v732_v23  ;;  %v825_v25 = vadd.s32 %v813_v32, %v811_v24  ;;  %v917_v40 = vrot.slane %v910_v9, %v1292_v29 }
 0x236   :  { %v741_v28 = vsel %vm737_vm7, %v705_v31, %v733_v60  ;;  %v764_v37 = vsel %vm1508_vm15, 0, %v740_v36  ;;  %v819_v41 = vrot.slane %v818_v35, 4 }
 0x237   :  { %v765_v43 = vsel %vm1508_vm15, 0, %v741_v28  ;;  %v971_v52 = vadd.s32 4294967295, %v764_v37  ;;  %vm780_vm10 = vcmp.gt.s32.totalorder %v764_v37, 0  ;;  %v826_v2 = vrot.slane %v825_v25, 4 }
 0x238   :  { %v869_v42 = vcombine.low %v764_v37, %v765_v43  ;;  %v924_v30 = vrot.slane %v917_v40, %v1292_v29  ;;  %v972_v58 = vadd.s32 4294967295, %v765_v43  ;;  %v820_v54 = vadd.s32 %v819_v41, %v818_v35 }
 0x239   :  { %vm781_vm14 = vcmp.gt.s32.totalorder %v765_v43, 0  ;;  %vm774_vm11 = vcmp.eq.s32.totalorder %v1061_v17, %v971_v52  ;;  %vm776_vm4 = vcmp.eq.s32.totalorder %v1071_v26, %v971_v52  ;;  %v827_v33 = vadd.s32 %v826_v2, %v825_v25 }
 0x23a   :  { %v876_v6 = vrot.slane %v869_v42, %v1292_v29  ;;  %975 = vst.msk [vmem:[%s1626_s4 + $0x9] ss:$4 sm:$0x3] %vm1680_vm0, %v924_v30  ;;  %vm775_vm15 = vcmp.eq.s32.totalorder %v1061_v17, %v972_v58  ;;  %vm777_vm12 = vcmp.eq.s32.totalorder %v1071_v26, %v972_v58  ;;  %vm1585_vm5 = vmand %vm774_vm11, %vm780_vm10  ;;  %v821_v16 = vrot.slane %v820_v54, 2 }
 0x23b   :  { %vm795_vm1 = vmand %vm775_vm15, %vm781_vm14  ;;  %v828_v59 = vrot.slane %v827_v33, 2  ;;  %v814_v17 = vsel %vm1585_vm5, %v806_v34, 0 }
 0x23c   :  { %v883_v46 = vrot.slane %v876_v6, %v1292_v29  ;;  %vm797_vm9 = vmand %vm777_vm12, %vm781_vm14  ;;  %v815_v57 = vsel %vm795_vm1, %v806_v34, 0  ;;  %v822_v44 = vadd.s32 %v821_v16, %v820_v54 }
 0x23d   :  { %vm796_vm8 = vmand %vm776_vm4, %vm780_vm10  ;;  %v817_v60 = vsel %vm797_vm9, %v809_v61, 0  ;;  %v829_v62 = vadd.s32 %v828_v59, %v827_v33 }
 0x23e   :  { %973 = vst.msk [vmem:[%s1626_s4 + $0x8] ss:$4 sm:$0x3] %vm1680_vm0, %v883_v46  ;;  %v816_v48 = vsel %vm796_vm8, %v809_v61, 0  ;;  %v839_v3 = vadd.s32 %v817_v60, %v815_v57  ;;  %v823_v53 = vrot.slane %v822_v44, 1 }
 0x23f   :  { %v832_v27 = vadd.s32 %v816_v48, %v814_v17  ;;  %v830_v49 = vrot.slane %v829_v62, 1 }
 0x240   :  { %v840_v21 = vrot.slane %v839_v3, 4  ;;  %v824_v4 = vadd.s32 %v823_v53, %v822_v44 }
 0x241   :  { %v833_v20 = vrot.slane %v832_v27, 4  ;;  %v831_v5 = vadd.s32 %v830_v49, %v829_v62 }
 0x242   :  { %v841_v7 = vadd.s32 %v840_v21, %v839_v3  ;;  %v846_v26 = vsel %vm778_vm13, %v824_v4, 4294967295 }
 0x243   :  { %v834_v1 = vadd.s32 %v833_v20, %v832_v27  ;;  %v847_v10 = vsel %vm779_vm6, %v831_v5, 4294967295 }
 0x244   :  { %v842_v39 = vrot.slane %v841_v7, 2  ;;  %v929_v0 = vcombine.low %v846_v26, %v847_v10 }
 0x245   :  { %v835_v11 = vrot.slane %v834_v1, 2 }
 0x246   :  { %v843_v51 = vadd.s32 %v842_v39, %v841_v7  ;;  %v936_v13 = vrot.slane %v929_v0, %v1292_v29 }
 0x247   :  { %v836_v14 = vadd.s32 %v835_v11, %v834_v1 }
 0x248   :  { %v844_v18 = vrot.slane %v843_v51, 1  ;;  %v943_v45 = vrot.slane %v936_v13, %v1292_v29 }
 0x249   :  { %v837_v12 = vrot.slane %v836_v14, 1 }
 0x24a   :  { %v845_v15 = vadd.s32 %v844_v18, %v843_v51  ;;  %976 = vst.msk [vmem:[%s1626_s4 + $0x2] ss:$4 sm:$0x3] %vm1680_vm0, %v943_v45 }
 0x24b   :  { %v838_v47 = vadd.s32 %v837_v12, %v836_v14 }
 0x24c   :  { %v849_v19 = vsel %vm781_vm14, %v845_v15, 4294967295 }
 0x24d   :  { %v848_v23 = vsel %vm780_vm10, %v838_v47, 4294967295 }
 0x24e   :  { %v944_v50 = vcombine.low %v848_v23, %v849_v19 }
 0x250   :  { %v951_v22 = vrot.slane %v944_v50, %v1292_v29 }
 0x252   :  { %v958_v24 = vrot.slane %v951_v22, %v1292_v29 }
 0x254   :  { %977 = vst.msk [vmem:[%s1626_s4 + $0xa] ss:$4 sm:$0x3] %vm1680_vm0, %v958_v24 }

</bundles_post_ra>
